<compile_context>
chip_gen: v7x
topology: tpu7x:2x2x1
jax: 0.10.0
libtpu: 0.0.40
codegen_flags: <defaults>
</compile_context>

<pallas_src>
import functools

import jax
import jax.numpy as jnp
from jax.experimental import pallas as pl
from jax.experimental.pallas import tpu as pltpu


def _round_up(x, m):
    return (x + m - 1) // m * m


def _to_poincare_kernel(x_ref, o_ref, *, c, clip_r):
    """Fused ToPoincare: out = x * total_scale, total_scale a [rows, 1] f32 column."""
    sqrt_c = jnp.float32(c ** 0.5)
    maxnorm = jnp.float32((1.0 - 1e-3) / (c ** 0.5))

    # Single cross-lane reduction; the f32 square is consumed inside the reduce so
    # no full-tile f32 temp stays live across it (matters for bf16 inputs).
    raw_sq = jnp.sum(jnp.square(x_ref[...].astype(jnp.float32)),
                     axis=-1, keepdims=True)                       # [rows, 1]
    raw_norm = jnp.sqrt(raw_sq)

    # --- optional feature clipping (https://arxiv.org/pdf/2107.11472.pdf) ---
    if clip_r is not None:
        fac = jnp.minimum(jnp.float32(1.0),
                          jnp.float32(clip_r) / (raw_norm + jnp.float32(1e-5)))
    else:
        fac = jnp.float32(1.0)

    # --- expmap0(x_clipped, c):  gamma = x_clipped * expmap_scale ---
    u_norm = jnp.maximum(raw_norm * fac, jnp.float32(1e-5))        # clamped norm
    t = jnp.tanh(jnp.minimum(sqrt_c * u_norm, jnp.float32(15.0)))
    expmap_scale = t / (sqrt_c * u_norm)                           # [rows, 1]

    # --- project(gamma, c):  rescale rows whose ||gamma|| exceeds maxnorm ---
    g_norm = jnp.maximum(raw_norm * fac * expmap_scale, jnp.float32(1e-5))
    proj_scale = jnp.where(g_norm > maxnorm, maxnorm / g_norm, jnp.float32(1.0))

    total_scale = fac * expmap_scale * proj_scale                  # [rows, 1] f32
    # RiemannianGradient.apply is identity in the forward pass.
    # TODO(synk): backward-pass Riemannian gradient rescaling not implemented.
    o_ref[...] = (x_ref[...] * total_scale.astype(x_ref.dtype)).astype(o_ref.dtype)


def to_poincare(x, *, c=1.0, clip_r=None, block_rows=None,
                target_block_bytes=4 * 1024 * 1024):
    """Map Euclidean points (features = last dim) into the Poincare ball."""
    orig_shape = x.shape
    orig_dtype = x.dtype
    d = orig_shape[-1]
    rows = 1
    for s in orig_shape[:-1]:
        rows *= s
    x2 = x.reshape(rows, d)

    itemsize = jnp.dtype(orig_dtype).itemsize
    # Sublane granularity: 8 for 4-byte dtypes, 16 for 2-byte (bf16) packing.
    row_mult = 16 if itemsize < 4 else 8

    # Feature dim must be lane-dense AND zero-padded (padded lanes feed the norm).
    # Only this (uncommon) case pays a wrapper-side copy.
    d_pad = _round_up(d, 128)
    pad_c = d_pad - d
    if pad_c:
        x2 = jnp.pad(x2, ((0, 0), (0, pad_c)))

    if block_rows is None:
        # Rows that fit the ~4 MiB streaming block at the actual itemsize.
        fit = max(row_mult, target_block_bytes // (d_pad * itemsize))
        # Keep >= ~4 grid steps on sizeable inputs: pipelining + v7x 2-TC sharding.
        cap = max(row_mult, _round_up(pl.cdiv(rows, 4), row_mult))
        block_rows = min(fit, cap)
    block_rows = _round_up(block_rows, row_mult)
    block_rows = min(block_rows, _round_up(rows, row_mult))

    grid = pl.cdiv(rows, block_rows)   # partial last block handled by Pallas masking

    kernel = functools.partial(_to_poincare_kernel, c=float(c),
                               clip_r=None if clip_r is None else float(clip_r))
    out = pl.pallas_call(
        kernel,
        out_shape=jax.ShapeDtypeStruct((rows, d_pad), orig_dtype),
        grid_spec=pltpu.PrefetchScalarGridSpec(
            num_scalar_prefetch=0,
            grid=(grid,),
            in_specs=[pl.BlockSpec((block_rows, d_pad), lambda i: (i, 0))],
            out_specs=pl.BlockSpec((block_rows, d_pad), lambda i: (i, 0)),
        ),
        compiler_params=pltpu.CompilerParams(
            dimension_semantics=("parallel",),   # shards row blocks across v7x's 2 TCs
            vmem_limit_bytes=32 * 1024 * 1024,
        ),
    )(x2)

    if pad_c:
        out = out[:, :d]
    return out.reshape(orig_shape)


def _to_poincare_ref(x, *, c=1.0, clip_r=None):
    """Pure-JAX reference mirroring hyptorch pmath (unfused, for correctness)."""
    x = x.astype(jnp.float32)
    sqrt_c = c ** 0.5
    if clip_r is not None:
        x_norm = jnp.linalg.norm(x, axis=-1, keepdims=True) + 1e-5
        fac = jnp.minimum(jnp.ones_like(x_norm), clip_r / x_norm)
        x = x * fac
    u_norm = jnp.maximum(jnp.linalg.norm(x, axis=-1, keepdims=True), 1e-5)
    gamma = jnp.tanh(jnp.clip(sqrt_c * u_norm, -15.0, 15.0)) * x / (sqrt_c * u_norm)
    g_norm = jnp.maximum(jnp.linalg.norm(gamma, axis=-1, keepdims=True), 1e-5)
    maxnorm = (1.0 - 1e-3) / sqrt_c
    return jnp.where(g_norm > maxnorm, gamma / g_norm * maxnorm, gamma)


if __name__ == "__main__":
    key = jax.random.PRNGKey(0)

    # Case 1: aligned f32, with clipping (clipped-HNN radius). Zero wrapper copies.
    x1 = jax.random.normal(key, (16, 128), dtype=jnp.float32) * 3.0
    out1 = jax.block_until_ready(to_poincare(x1, c=1.0, clip_r=2.3))
    ref1 = _to_poincare_ref(x1, c=1.0, clip_r=2.3)
    assert out1.shape == x1.shape and out1.dtype == x1.dtype
    assert jnp.max(jnp.abs(out1 - ref1)) < 1e-5

    # Case 2: ragged rows + non-128 feature dim, no clipping (partial row block +
    # feature zero padding path).
    x2 = jax.random.normal(jax.random.PRNGKey(1), (37, 96), dtype=jnp.float32) * 2.0
    out2 = jax.block_until_ready(to_poincare(x2, c=1.0, clip_r=None))
    ref2 = _to_poincare_ref(x2, c=1.0, clip_r=None)
    assert out2.shape == x2.shape and out2.dtype == x2.dtype
    assert jnp.max(jnp.abs(out2 - ref2)) < 1e-5

    # Case 3: multi-dim input (reshape path), different curvature.
    x3 = jax.random.normal(jax.random.PRNGKey(2), (2, 8, 64), dtype=jnp.float32)
    out3 = jax.block_until_ready(to_poincare(x3, c=0.5, clip_r=1.0))
    ref3 = _to_poincare_ref(x3, c=0.5, clip_r=1.0)
    assert out3.shape == x3.shape and out3.dtype == x3.dtype
    assert jnp.max(jnp.abs(out3 - ref3)) < 1e-5

    # Case 4: bf16 inputs (16-row sublane packing, bf16 full-tile multiply path).
    x4 = (jax.random.normal(jax.random.PRNGKey(3), (24, 128), dtype=jnp.float32)
          * 3.0).astype(jnp.bfloat16)
    out4 = jax.block_until_ready(to_poincare(x4, c=1.0, clip_r=2.3))
    ref4 = _to_poincare_ref(x4.astype(jnp.float32), c=1.0, clip_r=2.3)
    assert out4.shape == x4.shape and out4.dtype == x4.dtype
    assert jnp.max(jnp.abs(out4.astype(jnp.float32) - ref4)) < 2e-2

    print("KERNEL_OK")
</pallas_src>

<mosaic_0001>
module attributes {stable_mosaic.version = 11 : i64} {
  func.func @_to_poincare_kernel(%arg0: i32, %arg1: memref<8x128xf32, #tpu.memory_space<vmem>>, %arg2: memref<8x128xf32, #tpu.memory_space<vmem>>) attributes {dimension_semantics = [#tpu.dimension_semantics<parallel>], iteration_bounds = array<i64: 2>, scalar_prefetch = 0 : i64, scratch_operands = 0 : i64, tpu.core_type = #tpu.core_type<tc>, window_params = [{transform_indices = @transform_0, window_bounds = array<i64: 8, 128>}, {transform_indices = @transform_1, window_bounds = array<i64: 8, 128>}]} {
    %c0 = arith.constant 0 : index
    %c0_0 = arith.constant 0 : index
    %0 = vector.load %arg1[%c0, %c0_0] : memref<8x128xf32, #tpu.memory_space<vmem>>, vector<8x128xf32>
    %1 = arith.mulf %0, %0 : vector<8x128xf32>
    %cst = arith.constant dense<0.000000e+00> : vector<8xf32>
    %2 = vector.multi_reduction <add>, %1, %cst [1] : vector<8x128xf32> to vector<8xf32>
    %3 = vector.shape_cast %2 : vector<8xf32> to vector<8x1xf32>
    %4 = math.sqrt %3 : vector<8x1xf32>
    %cst_1 = arith.constant 9.99999974E-6 : f32
    %5 = vector.broadcast %cst_1 : f32 to vector<8x1xf32>
    %6 = arith.addf %4, %5 : vector<8x1xf32>
    %cst_2 = arith.constant 2.300000e+00 : f32
    %7 = vector.broadcast %cst_2 : f32 to vector<8x1xf32>
    %8 = arith.divf %7, %6 : vector<8x1xf32>
    %cst_3 = arith.constant 1.000000e+00 : f32
    %9 = vector.broadcast %cst_3 : f32 to vector<8x1xf32>
    %10 = arith.minimumf %9, %8 : vector<8x1xf32>
    %11 = arith.mulf %4, %10 : vector<8x1xf32>
    %cst_4 = arith.constant 9.99999974E-6 : f32
    %12 = vector.broadcast %cst_4 : f32 to vector<8x1xf32>
    %13 = arith.maximumf %11, %12 : vector<8x1xf32>
    %cst_5 = arith.constant 1.000000e+00 : f32
    %14 = vector.broadcast %cst_5 : f32 to vector<8x1xf32>
    %15 = arith.mulf %14, %13 : vector<8x1xf32>
    %cst_6 = arith.constant 1.500000e+01 : f32
    %16 = vector.broadcast %cst_6 : f32 to vector<8x1xf32>
    %17 = arith.minimumf %15, %16 : vector<8x1xf32>
    %18 = math.tanh %17 : vector<8x1xf32>
    %cst_7 = arith.constant 1.000000e+00 : f32
    %19 = vector.broadcast %cst_7 : f32 to vector<8x1xf32>
    %20 = arith.mulf %19, %13 : vector<8x1xf32>
    %21 = arith.divf %18, %20 : vector<8x1xf32>
    %22 = arith.mulf %4, %10 : vector<8x1xf32>
    %23 = arith.mulf %22, %21 : vector<8x1xf32>
    %cst_8 = arith.constant 9.99999974E-6 : f32
    %24 = vector.broadcast %cst_8 : f32 to vector<8x1xf32>
    %25 = arith.maximumf %23, %24 : vector<8x1xf32>
    %cst_9 = arith.constant 9.990000e-01 : f32
    %26 = vector.broadcast %cst_9 : f32 to vector<8x1xf32>
    %27 = arith.cmpf ogt, %25, %26 : vector<8x1xf32>
    %cst_10 = arith.constant 9.990000e-01 : f32
    %28 = vector.broadcast %cst_10 : f32 to vector<8x1xf32>
    %29 = arith.divf %28, %25 : vector<8x1xf32>
    %cst_11 = arith.constant 1.000000e+00 : f32
    %30 = vector.broadcast %cst_11 : f32 to vector<8x1xf32>
    %31 = arith.select %27, %29, %30 : vector<8x1xi1>, vector<8x1xf32>
    %32 = arith.mulf %10, %21 : vector<8x1xf32>
    %33 = arith.mulf %32, %31 : vector<8x1xf32>
    %c0_12 = arith.constant 0 : index
    %c0_13 = arith.constant 0 : index
    %34 = vector.load %arg1[%c0_12, %c0_13] : memref<8x128xf32, #tpu.memory_space<vmem>>, vector<8x128xf32>
    %35 = vector.broadcast %33 : vector<8x1xf32> to vector<8x128xf32>
    %36 = arith.mulf %34, %35 : vector<8x128xf32>
    %c0_14 = arith.constant 0 : index
    %c0_15 = arith.constant 0 : index
    %37 = vector.load %arg2[%c0_14, %c0_15] : memref<8x128xf32, #tpu.memory_space<vmem>>, vector<8x128xf32>
    tpu.vector_store %arg2[%c0_14, %c0_15], %36 {strides = array<i32>} : memref<8x128xf32, #tpu.memory_space<vmem>>, vector<8x128xf32>,
    return
  }
  func.func @transform_0(%arg0: i32) -> (i32, i32) {
    %c0_i32 = arith.constant 0 : i32
    %c0_i32_0 = arith.constant 0 : i32
    return %arg0, %c0_i32 : i32, i32
  }
  func.func @transform_1(%arg0: i32) -> (i32, i32) {
    %c0_i32 = arith.constant 0 : i32
    %c0_i32_0 = arith.constant 0 : i32
    return %arg0, %c0_i32 : i32, i32
  }
}

</mosaic_0001>

<bundles_post_ra>
// kernel: tpu_custom_call.1
= control target key start
LH: loop header
LB: loop body
LE: loop exit
PB: predicated region body
PF: predicated region fallthrough
CT: control target
= control target key end

     0   :  { %6 = vsyncpa [#allocation3], 0  ;;  %s590_s0 = inlined_call_operand.hbm [shape: f32[16,128], index: 0, kind: input, shape index: {}]   ;;  %s591_s1 = inlined_call_operand.hbm [shape: f32[16,128], index: 1, kind: output, shape index: {}]  }
   0x1   :  { %8 = vsyncpa [#allocation3 + $0x1], 0 }
   0x2   :  { %9 = vsyncpa [#allocation4], 0 }
   0x3   :  { %11 = vsyncpa [#allocation4 + $0x1], 0  ;;  %s425_s6 = smov 0   ;;  %s427_s7 = smov 0  }
   0x4   :  { %s429_s8 = smov 0   ;;  %s431_s9 = smov 0  }
   0x5 LB: > { %s446_s10 = sadd.s32 4294967295, %s411_s9   ;;  %s247_s11 = sadd.s32 4294967294, %s411_s9   ;;  %s411_s9 = sphi %s431_s9, %s606_s9   ;;  %s407_s8 = sphi %s429_s8, %s605_s8   ;;  %s403_s7 = sphi %s427_s7, %s604_s7   ;;  %s399_s6 = sphi %s425_s6, %s603_s6  }
   0x6   : > { %s450_s12 = sadd.s32 1, %s411_s9   ;;  %s24_s13 = sadd.s32 1, %s407_s8 }
   0x7   : > { %s21_s14 = ssub.s32 %s411_s9, %s450_s12  ;;  %p31_p0 = scmp.ne.s32.totalorder %s407_s8, %s403_s7 }
   0x8   : > { %p22_p1 = scmp.eq.s32.totalorder %s21_s14, 0  ;;  %p32_p2 = scmp.eq.s32.totalorder %s411_s9, 0 }
   0x9   : > { %p37_p3 = scmp.ne.s32.totalorder %s403_s7, %s399_s6  ;;  %p38_p4 = scmp.eq.s32.totalorder %s446_s10, 0 }
   0xa   : > { %s462_s15 = scalar_select %p22_p1, %s407_s8, %s24_s13  }
   0xb   : > { %p464_p5 = por %p32_p2, %p31_p0  ;;  %p468_p6 = por %p38_p4, %p37_p3 }
   0xc   : > { %p61_p7 = scmp.eq.s32.totalorder %s446_s10, 1  ;;  %p67_p8 = scmp.eq.s32.totalorder %s247_s11, 1 }
   0xd   : > { %p271_p10 = scmp.lt.s32.totalorder %s411_s9, 2  ;;  %s87_s20 = sand.u32 1, %s407_s8  }
   0xe   : > { %p475_p11 = por %p61_p7, %p31_p0  ;;  %p479_p12 = por %p67_p8, %p37_p3 }
   0xf   : > { %s251_s21 = sshll.u32 %s411_s9, 7  ;;  %s250_s22 = sshll.u32 %s87_s20, 3 }
  0x10   : > { %s595_s18 = scalar_select %p475_p11, 1, 0 }
  0x11   : > { %s596_s19 = scalar_select %p479_p12, 1, 0 }
  0x12   : > { %s488_s25 = scalar_lea.hbm %s590_s0, %s251_s21  ;;  %s91_s26 = scalar_lea.vmem [#allocation2], %s250_s22 }
  0x13   : > { %s98_s27 = sshll.u32 %s91_s26, 4  ;;  %p492_p13 = pnand %p271_p10, %p464_p5  ;;  %s496_s27 = int_to_ptr.vmem [resolvable:$true] %s98_s27 }
  0x14   : > { %s88_s29 = scalar_lea.sflag [#allocation3], %s87_s20  ;;  %s315_s30 = scalar_lea.hbm %s488_s25, 128 }
  0x15   : > { %p316_p2 = scmp.ne.s32.totalorder %s488_s25, %s315_s30  ;;  %p317_p3 = pneg %p492_p13 }
  0x16   : > { %s320_s4 = scalar_lea.hbm %s590_s0, 256  ;;  %p321_p5 = scmp.lt.u32.totalorder %s488_s25, %s590_s0 }
  0x17   : > { %p318_p4 = pnand %p317_p3, %p316_p2  ;;  %p322_p8 = scmp.lt.u32.totalorder %s320_s4, %s315_s30 }
  0x18   : > { %p324_p9 = scmp.lt.u32.totalorder %s315_s30, %s488_s25 }
  0x19   : > { %p319_p7 = pneg %p318_p4  ;;  %p323_p10 = por %p322_p8, %p321_p5 }
  0x1b   : > { %p325_p0 = por %p324_p9, %p323_p10 }
  0x1d   : > { %p326_p1 = pnand %p325_p0, %p319_p7 }
  0x1f   : > { %329 = shalt.err (!%p326_p1)
}
  0x20   : > { %s330_s13 = scalar_lea.vmem %s496_s27, 128  ;;  %s413_s14 = smov [#allocation2]  }
  0x21   : > { %p331_p2 = scmp.ne.s32.totalorder %s496_s27, %s330_s13  ;;  %s335_s16 = sshll.u32 %s413_s14, 4  ;;  %s336_s16 = int_to_ptr.vmem [resolvable:$false] %s335_s16 }
  0x22   : > { %s337_s20 = scalar_lea.vmem %s336_s16, 256  ;;  %p338_p11 = scmp.lt.s32.totalorder %s496_s27, %s336_s16 }
  0x23   : > { %p333_p4 = pnand %p331_p2, %p317_p3  ;;  %p339_p5 = scmp.lt.s32.totalorder %s337_s20, %s330_s13 }
  0x25   : > { %p334_p12 = pneg %p333_p4  ;;  %p340_p8 = por %p339_p5, %p338_p11 }
  0x27   : > { %p341_p9 = pnand %p340_p8, %p334_p12 }
  0x29   : > { %344 = shalt.err (!%p341_p9)
}
  0x2a   : > { %266 = dma.hbm_to_vmem [thread:$0]  (!%p492_p13), %s488_s25, 128, %s496_s27, %s88_s29  }
  0x2b   : > { %p598_p0 = scmp.lt.s32.totalorder %s411_s9, 3  ;;  %p599_p1 = scmp.ge.s32.totalorder %s411_s9, 1 }
  0x2d   : > { %p104_p3 = pnand %p599_p1, %p598_p0 }
  0x2e   : > { %s530_s21 = sand.u32 (!%p104_p3), 1, %s403_s7  }
  0x2f   : > { %107 = sbr.rel (%p104_p3) target bundleno = 287 (0x11f), region = 24  ;;  %s253_s22 = sshll.u32 (!%p104_p3), %s530_s21, 3 }
  0x30   : > { %s110_s23 = scalar_lea.sflag (!%p104_p3), [#allocation3], %s530_s21  ;;  %s113_s24 = scalar_lea.vmem (!%p104_p3), [#allocation2], %s253_s22 }
  0x36   : > { %390 = dma.done.wait (%p468_p6), %s110_s23, 128  }
  0x37   : > { %392 = vsyncadd (%p468_p6), %s110_s23, 4294967168  ;;  %v132_v0 = vld [vmem:[%s113_s24] sm:$0xff]  ;;  %s256_s17 = sshll.u32 %s446_s10, 7  ;;  %s131_s25 = scalar_lea.vmem [#allocation5], %s253_s22 }
  0x38   : > { %v133_v1 = vmul.f32 %v132_v0, %v132_v0  ;;  %s177_s26 = sshll.u32 %s131_s25, 4  ;;  %s546_s29 = scalar_lea.hbm %s591_s1, %s256_s17  ;;  %s548_s26 = int_to_ptr.vmem [resolvable:$true] %s177_s26 }
  0x39   : > { %s164_s30 = scalar_lea.sflag [#allocation4], %s530_s21  ;;  %s345_s2 = scalar_lea.vmem %s548_s26, 128 }
  0x3a   : > { %134 = vadd.xlane.f32.xlu0 %v133_v1  ;;  %p346_p6 = scmp.ne.s32.totalorder %s548_s26, %s345_s2  ;;  %p600_p11 = scmp.ne.s32.totalorder %s595_s18, 0 }
  0x3b   : > { %s414_s10 = smov [#allocation5]  }
  0x3c   : > { %p347_p12 = pnand %p346_p6, %p600_p11  ;;  %s349_s3 = sshll.u32 %s414_s10, 4  ;;  %s350_s3 = int_to_ptr.vmem [resolvable:$false] %s349_s3 }
  0x3d   : > { %s351_s4 = scalar_lea.vmem %s350_s3, 256  ;;  %p352_p7 = scmp.lt.s32.totalorder %s548_s26, %s350_s3 }
  0x3e   : > { %p348_p13 = pneg %p347_p12  ;;  %p353_p10 = scmp.lt.s32.totalorder %s351_s4, %s345_s2 }
  0x40   : > { %p354_p2 = por %p353_p10, %p352_p7 }
  0x42   : > { %p355_p4 = pnand %p354_p2, %p348_p13 }
  0xc7   : > { %v135_v2 = vpop.xlane.xlu0 %134 }
  0xc8   : > { %305 = vrsqrt.f32 %v135_v2  ;;  %vm138_vm0 = vcmp.eq.f32.partialorder %v135_v2, inf  ;;  %v141_v5 = vand.u32 2147483648, %v135_v2  ;;  %vm140_vm1 = vcmp.eq.f32.partialorder %v135_v2, 0.0 }
  0xd2   : > { %v306_v3 = vpop.eup %305 }
  0xd3   : > { %v137_v4 = vmul.f32 %v306_v3, %v135_v2 }
  0xd5   : > { %v139_v6 = vsel %vm138_vm0, %v135_v2, %v137_v4 }
  0xd6   : > { %v142_v7 = vsel %vm140_vm1, %v141_v5, %v139_v6 }
  0xd7   : > { %v143_v8 = vadd.f32 1e-05, %v142_v7 }
  0xd9   : > { %307 = vrcp.f32 %v143_v8 }
  0xe3   : > { %v308_v9 = vpop.eup %307 }
  0xe4   : > { %v145_v10 = vmul.f32 2.3, %v308_v9 }
  0xe6   : > { %v146_v11 = vmin.f32 %v145_v10, 1.0 }
  0xe8   : > { %v147_v12 = vmul.f32 %v146_v11, %v142_v7 }
  0xea   : > { %v148_v13 = vmax.f32 %v147_v12, 1e-05 }
  0xec   : > { %v149_v14 = vmin.f32 %v148_v13, 15.0  ;;  %309 = vrcp.f32 %v148_v13 }
  0xee   : > { %311 = vtanh.f32 %v149_v14 }
  0xf6   : > { %v310_v15 = vpop.eup %309 }
  0xf8   : > { %v312_v16 = vpop.eup %311 }
  0xf9   : > { %v152_v17 = vmul.f32 %v312_v16, %v310_v15 }
  0xfb   : > { %v153_v18 = vmul.f32 %v152_v17, %v147_v12  ;;  %v159_v22 = vmul.f32 %v152_v17, %v146_v11 }
  0xfd   : > { %v154_v19 = vmax.f32 %v153_v18, 1e-05 }
  0xff   : > { %313 = vrcp.f32 %v154_v19  ;;  %vm155_vm2 = vcmp.gt.f32.partialorder %v154_v19, 0.999 }
 0x109   : > { %v314_v20 = vpop.eup %313 }
 0x10a   : > { %v157_v21 = vmul.f32 0.999, %v314_v20 }
 0x10c   : > { %v158_v23 = vsel %vm155_vm2, %v157_v21, 1.0 }
 0x10d   : > { %v160_v24 = vmul.f32 %v159_v22, %v158_v23 }
 0x10f   : > { %v161_v25 = vmul.f32 %v160_v24, %v132_v0 }
 0x111   : > { %162 = vst [vmem:[%s131_s25] sm:$0xff] %v161_v25 }
 0x112   : > { %358 = shalt.err (!%p355_p4)
}
 0x113   : > { %s359_s5 = scalar_lea.hbm %s546_s29, 128  ;;  %s363_s14 = scalar_lea.hbm %s591_s1, 256 }
 0x114   : > { %p360_p5 = scmp.ne.s32.totalorder %s546_s29, %s359_s5  ;;  %p364_p0 = scmp.lt.u32.totalorder %s546_s29, %s591_s1 }
 0x115   : > { %p365_p1 = scmp.lt.u32.totalorder %s363_s14, %s359_s5  ;;  %p367_p6 = scmp.lt.u32.totalorder %s359_s5, %s546_s29 }
 0x116   : > { %p361_p8 = pnand %p360_p5, %p600_p11 }
 0x117   : > { %p366_p3 = por %p365_p1, %p364_p0 }
 0x118   : > { %p362_p9 = pneg %p361_p8 }
 0x119   : > { %p368_p12 = por %p367_p6, %p366_p3 }
 0x11b   : > { %p369_p13 = pnand %p368_p12, %p362_p9 }
 0x11d   : > { %372 = shalt.err (!%p369_p13)
}
 0x11e   : > { %261 = dma.vmem_to_hbm [thread:$0]  (%p600_p11), %s548_s26, 128, %s546_s29, %s164_s30  }
 0x11f PF: > { %s189_s21 = sand.u32 1, %s399_s6   ;;  %p601_p7 = scmp.ne.s32.totalorder %s596_s19, 0 }
 0x120   : > { %p602_p10 = scmp.ge.s32.totalorder %s411_s9, 2  ;;  %s190_s22 = scalar_lea.sflag [#allocation4], %s189_s21 }
 0x122   : > { %p268_p2 = pnand %p602_p10, %p601_p7 }
 0x124   : > { %394 = dma.done.wait (!%p268_p2), %s190_s22, 128  }
 0x125   : > { %396 = vsyncadd (!%p268_p2), %s190_s22, 4294967168  ;;  %p14_p4 = scmp.ge.s32.totalorder %s450_s12, 4   ;;  %s603_s6 = smov %s403_s7 }
 0x126   : > { %s604_s7 = smov %s407_s8  ;;  %s605_s8 = smov %s462_s15 }
 0x127   : > { %s606_s9 = smov %s450_s12  ;;  %16 = sbr.rel (!%p14_p4) target bundleno = 5 (0x5), region = 69 }
 0x12e   :  { %195 = vsyncpa [#allocation3], 1 }
 0x12f   :  { %197 = vsyncpa [#allocation3 + $0x1], 1 }
 0x130   :  { %198 = vsyncpa [#allocation4], 1 }
 0x131   :  { %200 = vsyncpa [#allocation4 + $0x1], 1 }

</bundles_post_ra>
